<compile_context>
chip_gen: v7x
topology: tpu7x:2x2x1
jax: 0.10.0
libtpu: 0.0.40
codegen_flags: <defaults>
</compile_context>

<pallas_src>
import math

import jax
import jax.numpy as jnp
from jax.experimental import pallas as pl
from jax.experimental.pallas import tpu as pltpu

LN_EPS = 1e-12  # BERT default layer_norm_eps


def _gelu_erf(x):
    # Matches torch.nn.functional.gelu (default, exact erf form).
    return 0.5 * x * (1.0 + jax.lax.erf(x * (1.0 / math.sqrt(2.0))))


def mlm_head_kernel(x_ref, w1_ref, b1_ref, gamma_ref, beta_ref,
                    w2_ref, bias_ref, out_ref, h_ref):
    # Grid: (i = row blocks [parallel], j = vocab blocks [arbitrary, inner]).
    # x_ref:    (TM, H)   w1_ref: (H, H)    b1/gamma/beta: (1, H) f32
    # w2_ref:   (H, TN)   bias_ref: (1, TN) f32
    # out_ref:  (TM, TN)  h_ref (scratch): (TM, H) in the matmul dtype.

    @pl.when(pl.program_id(1) == 0)
    def _():
        # ---- transform.dense : Linear(H, H), f32 accumulation on the MXU ----
        h = jnp.dot(x_ref[...], w1_ref[...], preferred_element_type=jnp.float32)
        h = h + b1_ref[...]

        # ---- transform.transform_act_fn : GELU (erf form) ----
        h = _gelu_erf(h)

        # ---- transform.LayerNorm (single-pass sum / sum-of-squares) ----
        inv_n = 1.0 / h.shape[-1]
        s = jnp.sum(h, axis=-1, keepdims=True)
        ss = jnp.sum(h * h, axis=-1, keepdims=True)
        mean = s * inv_n
        var = ss * inv_n - mean * mean
        h = (h - mean) * jax.lax.rsqrt(var + LN_EPS)
        h = h * gamma_ref[...] + beta_ref[...]

        # Cache the transformed activations for every vocab tile of this row block.
        h_ref[...] = h.astype(h_ref.dtype)

    # ---- decoder : Linear(H, V, bias=False) + bias, streamed over vocab ----
    logits = jnp.dot(h_ref[...], w2_ref[...], preferred_element_type=jnp.float32)
    out_ref[...] = (logits + bias_ref[...]).astype(out_ref.dtype)


def _pick_tile(dim, target, align):
    """Largest align-multiple divisor of `dim` that is <= target (or `dim`)."""
    if dim <= target:
        return dim
    t = (min(target, dim) // align) * align
    while t >= align:
        if dim % t == 0:
            return t
        t -= align
    return dim


def _vmem_estimate(tm, tn, hdim, act_bytes, out_bytes):
    """Byte estimate of what lives in VMEM for one pipelined grid step."""
    resident = 2 * hdim * hdim * act_bytes + 2 * 3 * hdim * 4   # w1 + b1/gamma/beta
    x_tile = 2 * tm * hdim * act_bytes                          # double-buffered
    w2_tile = 2 * hdim * tn * act_bytes
    bias_tile = 2 * tn * 4
    out_tile = 2 * tm * tn * out_bytes
    scratch = tm * hdim * max(act_bytes, 4)                     # cached transform h
    return resident + x_tile + w2_tile + bias_tile + out_tile + scratch


def mlm_head(x, params, *, tm=None, tn=None):
    """x: [batch, seq, hidden] -> logits [batch, seq, vocab]."""
    b, s, hdim = x.shape
    vdim = params["w2"].shape[1]
    m = b * s
    x2d = x.reshape(m, hdim)

    # Matmul operands share the activation dtype (bf16 in -> bf16 MXU operands,
    # f32 accumulation); affine / bias parameters stay f32 for accuracy.
    w1 = params["w1"].astype(x.dtype)
    w2 = params["w2"].astype(x.dtype)
    b1 = params["b1"].astype(jnp.float32)
    gamma = params["gamma"].astype(jnp.float32)
    beta = params["beta"].astype(jnp.float32)
    bias = params["bias"].astype(jnp.float32)

    # Generation-aware VMEM budget (v7x: 64 MiB per TC, v5e/v6e: 128 MiB).
    try:
        vmem_cap = getattr(pltpu.get_tpu_info(), "vmem_capacity_bytes", 128 << 20)
    except Exception:
        vmem_cap = 128 << 20
    vmem_limit = min(int(vmem_cap * 3 // 4), 112 << 20)
    vmem_budget = int(vmem_limit * 0.85)  # headroom for compiler-internal scratch

    act_bytes = jnp.dtype(x.dtype).itemsize
    out_bytes = jnp.dtype(x.dtype).itemsize

    user_tiles = tm is not None or tn is not None
    if tm is None:
        tm = 256
    if tn is None:
        tn = 2048 if vmem_cap <= (64 << 20) else 4096
    tm = _pick_tile(m, tm, 8)       # second-minor axis: multiple of 8 (or full)
    tn = _pick_tile(vdim, tn, 128)  # lane axis: multiple of 128 (or full)

    # Shrink tiles (vocab first, then rows) until the VMEM estimate fits,
    # unless the caller pinned them explicitly.
    if not user_tiles:
        while (_vmem_estimate(tm, tn, hdim, act_bytes, out_bytes) > vmem_budget
               and tn > 128):
            tn = _pick_tile(vdim, max(tn // 2, 128), 128)
        while (_vmem_estimate(tm, tn, hdim, act_bytes, out_bytes) > vmem_budget
               and tm > 8):
            tm = _pick_tile(m, max(tm // 2, 8), 8)

    grid = (m // tm, vdim // tn)    # rows outer (parallel), vocab inner (arbitrary)

    cost = pl.CostEstimate(
        flops=2 * m * hdim * hdim + 2 * m * hdim * vdim,
        transcendentals=m * hdim,
        bytes_accessed=(m * hdim * act_bytes                 # x
                        + hdim * hdim * act_bytes            # w1
                        + hdim * vdim * act_bytes            # w2
                        + m * vdim * out_bytes),             # logits
    )

    out2d = pl.pallas_call(
        mlm_head_kernel,
        out_shape=jax.ShapeDtypeStruct((m, vdim), x.dtype),
        grid=grid,
        in_specs=[
            pl.BlockSpec((tm, hdim), lambda i, j: (i, 0)),    # x   (per row block)
            pl.BlockSpec((hdim, hdim), lambda i, j: (0, 0)),  # w1  (VMEM resident)
            pl.BlockSpec((1, hdim), lambda i, j: (0, 0)),     # b1
            pl.BlockSpec((1, hdim), lambda i, j: (0, 0)),     # gamma
            pl.BlockSpec((1, hdim), lambda i, j: (0, 0)),     # beta
            pl.BlockSpec((hdim, tn), lambda i, j: (0, j)),    # w2  (streamed)
            pl.BlockSpec((1, tn), lambda i, j: (0, j)),       # decoder bias
        ],
        out_specs=pl.BlockSpec((tm, tn), lambda i, j: (i, j)),
        scratch_shapes=[pltpu.VMEM((tm, hdim), x.dtype)],     # cached transform h
        compiler_params=pltpu.CompilerParams(
            dimension_semantics=("parallel", "arbitrary"),
            vmem_limit_bytes=vmem_limit,
        ),
        cost_estimate=cost,
    )(x2d, w1, b1, gamma, beta, w2, bias)

    return out2d.reshape(b, s, vdim)


def init_params(key, hidden_size, vocab_size, dtype=jnp.float32):
    """Deterministic synthetic parameters (same shapes as the PyTorch module)."""
    k1, k2, k3 = jax.random.split(key, 3)
    lim1 = 1.0 / math.sqrt(hidden_size)
    # nn.Linear stores weight as [out, in]; we store transposed [in, out].
    w1 = jax.random.uniform(k1, (hidden_size, hidden_size), dtype,
                            minval=-lim1, maxval=lim1)
    b1 = jax.random.uniform(k2, (1, hidden_size), dtype,
                            minval=-lim1, maxval=lim1)
    gamma = jnp.ones((1, hidden_size), dtype)
    beta = jnp.zeros((1, hidden_size), dtype)
    w2 = jax.random.uniform(k3, (hidden_size, vocab_size), dtype,
                            minval=-lim1, maxval=lim1)
    bias = jnp.zeros((1, vocab_size), dtype)  # self.bias = zeros(vocab_size)
    return {"w1": w1, "b1": b1, "gamma": gamma, "beta": beta,
            "w2": w2, "bias": bias}


def mlm_head_ref(x, params):
    """Pure-JAX reference for a sanity check."""
    b, s, hdim = x.shape
    x2d = x.reshape(b * s, hdim).astype(jnp.float32)
    h = x2d @ params["w1"].astype(jnp.float32) + params["b1"].astype(jnp.float32)
    h = _gelu_erf(h)
    mean = jnp.mean(h, axis=-1, keepdims=True)
    var = jnp.mean((h - mean) ** 2, axis=-1, keepdims=True)
    h = (h - mean) * jax.lax.rsqrt(var + LN_EPS)
    h = h * params["gamma"].astype(jnp.float32) + params["beta"].astype(jnp.float32)
    out = h @ params["w2"].astype(jnp.float32) + params["bias"].astype(jnp.float32)
    return out.reshape(b, s, -1)


if __name__ == "__main__":
    key = jax.random.PRNGKey(0)

    # ---- Config A: small shapes, single-tile grid, tight f32 check ----
    batch, seq, hidden, vocab = 2, 8, 32, 128
    kx, kp, key = jax.random.split(key, 3)
    x = jax.random.normal(kx, (batch, seq, hidden), jnp.float32)
    params = init_params(kp, hidden, vocab)

    out = jax.block_until_ready(mlm_head(x, params))
    ref = mlm_head_ref(x, params)
    assert out.shape == (batch, seq, vocab)
    assert jnp.allclose(out, ref, atol=1e-4, rtol=1e-4)

    # ---- Config B: exercise the tiled (rows, vocab) grid with scratch reuse ----
    batch2, seq2, hidden2, vocab2 = 2, 16, 128, 512
    kx2, kp2, key = jax.random.split(key, 3)
    x2 = jax.random.normal(kx2, (batch2, seq2, hidden2), jnp.float32)
    params2 = init_params(kp2, hidden2, vocab2)

    out2 = jax.block_until_ready(mlm_head(x2, params2, tm=16, tn=128))  # grid (2, 4)
    ref2 = mlm_head_ref(x2, params2)
    assert out2.shape == (batch2, seq2, vocab2)
    assert jnp.allclose(out2, ref2, atol=1e-4, rtol=1e-4)

    # ---- Default (auto) tile selection path on the same data ----
    out3 = jax.block_until_ready(mlm_head(x2, params2))
    assert jnp.allclose(out3, ref2, atol=1e-4, rtol=1e-4)

    # ---- bf16 MXU fast path: verify it runs and produces finite logits ----
    out_bf16 = jax.block_until_ready(
        mlm_head(x2.astype(jnp.bfloat16), params2, tm=16, tn=128))
    assert out_bf16.shape == (batch2, seq2, vocab2)
    assert out_bf16.dtype == jnp.bfloat16
    assert bool(jnp.all(jnp.isfinite(out_bf16.astype(jnp.float32))))

    print("KERNEL_OK")
</pallas_src>

<mosaic_0001>
module attributes {stable_mosaic.version = 11 : i64} {
  func.func @mlm_head_kernel(%arg0: i32, %arg1: i32, %arg2: memref<16x32xf32, #tpu.memory_space<vmem>>, %arg3: memref<32x32xf32, #tpu.memory_space<vmem>>, %arg4: memref<1x32xf32, #tpu.memory_space<vmem>>, %arg5: memref<1x32xf32, #tpu.memory_space<vmem>>, %arg6: memref<1x32xf32, #tpu.memory_space<vmem>>, %arg7: memref<32x128xf32, #tpu.memory_space<vmem>>, %arg8: memref<1x128xf32, #tpu.memory_space<vmem>>, %arg9: memref<16x128xf32, #tpu.memory_space<vmem>>, %arg10: memref<16x32xf32, #tpu.memory_space<vmem>>) attributes {dimension_semantics = [#tpu.dimension_semantics<parallel>, #tpu.dimension_semantics<arbitrary>], iteration_bounds = array<i64: 1, 1>, scalar_prefetch = 0 : i64, scratch_operands = 1 : i64, tpu.core_type = #tpu.core_type<tc>, window_params = [{transform_indices = @transform_0, window_bounds = array<i64: 16, 32>}, {pipeline_mode = #tpu.pipeline_mode<synchronous>, transform_indices = @transform_1, window_bounds = array<i64: 32, 32>}, {pipeline_mode = #tpu.pipeline_mode<synchronous>, transform_indices = @transform_2, window_bounds = array<i64: 1, 32>}, {pipeline_mode = #tpu.pipeline_mode<synchronous>, transform_indices = @transform_3, window_bounds = array<i64: 1, 32>}, {pipeline_mode = #tpu.pipeline_mode<synchronous>, transform_indices = @transform_4, window_bounds = array<i64: 1, 32>}, {transform_indices = @transform_5, window_bounds = array<i64: 32, 128>}, {transform_indices = @transform_6, window_bounds = array<i64: 1, 128>}, {transform_indices = @transform_7, window_bounds = array<i64: 16, 128>}]} {
    %c0_i32 = arith.constant 0 : i32
    %0 = arith.cmpi eq, %arg1, %c0_i32 : i32
    %1 = arith.extui %0 : i1 to i32
    %c0_i32_0 = arith.constant 0 : i32
    %2 = arith.cmpi ne, %1, %c0_i32_0 : i32
    scf.if %2 {
      %c0_8 = arith.constant 0 : index
      %c0_9 = arith.constant 0 : index
      %10 = vector.load %arg2[%c0_8, %c0_9] : memref<16x32xf32, #tpu.memory_space<vmem>>, vector<16x32xf32>
      %c0_10 = arith.constant 0 : index
      %c0_11 = arith.constant 0 : index
      %11 = vector.load %arg3[%c0_10, %c0_11] : memref<32x32xf32, #tpu.memory_space<vmem>>, vector<32x32xf32>
      %cst_12 = arith.constant dense<0.000000e+00> : vector<16x32xf32>
      %12 = tpu.matmul %10, %11, %cst_12 {dimension_numbers = #tpu.dot_dimension_numbers<[1], [0], [0], [1], [0, 0, 1, 1], [], []>} : vector<16x32xf32>, vector<32x32xf32>, vector<16x32xf32> -> vector<16x32xf32>
      %c0_13 = arith.constant 0 : index
      %c0_14 = arith.constant 0 : index
      %13 = vector.load %arg4[%c0_13, %c0_14] : memref<1x32xf32, #tpu.memory_space<vmem>>, vector<1x32xf32>
      %14 = vector.broadcast %13 : vector<1x32xf32> to vector<16x32xf32>
      %15 = arith.addf %12, %14 : vector<16x32xf32>
      %cst_15 = arith.constant 5.000000e-01 : f32
      %16 = vector.broadcast %cst_15 : f32 to vector<16x32xf32>
      %17 = arith.mulf %16, %15 : vector<16x32xf32>
      %cst_16 = arith.constant 0.707106769 : f32
      %18 = vector.broadcast %cst_16 : f32 to vector<16x32xf32>
      %19 = arith.mulf %15, %18 : vector<16x32xf32>
      %20 = math.erf %19 : vector<16x32xf32>
      %cst_17 = arith.constant 1.000000e+00 : f32
      %21 = vector.broadcast %cst_17 : f32 to vector<16x32xf32>
      %22 = arith.addf %21, %20 : vector<16x32xf32>
      %23 = arith.mulf %17, %22 : vector<16x32xf32>
      %cst_18 = arith.constant dense<0.000000e+00> : vector<16xf32>
      %24 = vector.multi_reduction <add>, %23, %cst_18 [1] : vector<16x32xf32> to vector<16xf32>
      %25 = vector.shape_cast %24 : vector<16xf32> to vector<16x1xf32>
      %26 = arith.mulf %23, %23 : vector<16x32xf32>
      %cst_19 = arith.constant dense<0.000000e+00> : vector<16xf32>
      %27 = vector.multi_reduction <add>, %26, %cst_19 [1] : vector<16x32xf32> to vector<16xf32>
      %28 = vector.shape_cast %27 : vector<16xf32> to vector<16x1xf32>
      %cst_20 = arith.constant 3.125000e-02 : f32
      %29 = vector.broadcast %cst_20 : f32 to vector<16x1xf32>
      %30 = arith.mulf %25, %29 : vector<16x1xf32>
      %cst_21 = arith.constant 3.125000e-02 : f32
      %31 = vector.broadcast %cst_21 : f32 to vector<16x1xf32>
      %32 = arith.mulf %28, %31 : vector<16x1xf32>
      %33 = arith.mulf %30, %30 : vector<16x1xf32>
      %34 = arith.subf %32, %33 : vector<16x1xf32>
      %35 = vector.broadcast %30 : vector<16x1xf32> to vector<16x32xf32>
      %36 = arith.subf %23, %35 : vector<16x32xf32>
      %cst_22 = arith.constant 9.99999996E-13 : f32
      %37 = vector.broadcast %cst_22 : f32 to vector<16x1xf32>
      %38 = arith.addf %34, %37 : vector<16x1xf32>
      %39 = math.rsqrt %38 : vector<16x1xf32>
      %40 = vector.broadcast %39 : vector<16x1xf32> to vector<16x32xf32>
      %41 = arith.mulf %36, %40 : vector<16x32xf32>
      %c0_23 = arith.constant 0 : index
      %c0_24 = arith.constant 0 : index
      %42 = vector.load %arg5[%c0_23, %c0_24] : memref<1x32xf32, #tpu.memory_space<vmem>>, vector<1x32xf32>
      %43 = vector.broadcast %42 : vector<1x32xf32> to vector<16x32xf32>
      %44 = arith.mulf %41, %43 : vector<16x32xf32>
      %c0_25 = arith.constant 0 : index
      %c0_26 = arith.constant 0 : index
      %45 = vector.load %arg6[%c0_25, %c0_26] : memref<1x32xf32, #tpu.memory_space<vmem>>, vector<1x32xf32>
      %46 = vector.broadcast %45 : vector<1x32xf32> to vector<16x32xf32>
      %47 = arith.addf %44, %46 : vector<16x32xf32>
      %c0_27 = arith.constant 0 : index
      %c0_28 = arith.constant 0 : index
      %48 = vector.load %arg10[%c0_27, %c0_28] : memref<16x32xf32, #tpu.memory_space<vmem>>, vector<16x32xf32>
      tpu.vector_store %arg10[%c0_27, %c0_28], %47 {strides = array<i32>} : memref<16x32xf32, #tpu.memory_space<vmem>>, vector<16x32xf32>,
    } else {
    }
    %c0 = arith.constant 0 : index
    %c0_1 = arith.constant 0 : index
    %3 = vector.load %arg10[%c0, %c0_1] : memref<16x32xf32, #tpu.memory_space<vmem>>, vector<16x32xf32>
    %c0_2 = arith.constant 0 : index
    %c0_3 = arith.constant 0 : index
    %4 = vector.load %arg7[%c0_2, %c0_3] : memref<32x128xf32, #tpu.memory_space<vmem>>, vector<32x128xf32>
    %cst = arith.constant dense<0.000000e+00> : vector<16x128xf32>
    %5 = tpu.matmul %3, %4, %cst {dimension_numbers = #tpu.dot_dimension_numbers<[1], [0], [0], [1], [0, 0, 1, 1], [], []>} : vector<16x32xf32>, vector<32x128xf32>, vector<16x128xf32> -> vector<16x128xf32>
    %c0_4 = arith.constant 0 : index
    %c0_5 = arith.constant 0 : index
    %6 = vector.load %arg8[%c0_4, %c0_5] : memref<1x128xf32, #tpu.memory_space<vmem>>, vector<1x128xf32>
    %7 = vector.broadcast %6 : vector<1x128xf32> to vector<16x128xf32>
    %8 = arith.addf %5, %7 : vector<16x128xf32>
    %c0_6 = arith.constant 0 : index
    %c0_7 = arith.constant 0 : index
    %9 = vector.load %arg9[%c0_6, %c0_7] : memref<16x128xf32, #tpu.memory_space<vmem>>, vector<16x128xf32>
    tpu.vector_store %arg9[%c0_6, %c0_7], %8 {strides = array<i32>} : memref<16x128xf32, #tpu.memory_space<vmem>>, vector<16x128xf32>,
    return
  }
  func.func @transform_0(%arg0: i32, %arg1: i32) -> (i32, i32) {
    %c0_i32 = arith.constant 0 : i32
    %c0_i32_0 = arith.constant 0 : i32
    return %arg0, %c0_i32 : i32, i32
  }
  func.func @transform_1(%arg0: i32, %arg1: i32) -> (i32, i32) {
    %c0_i32 = arith.constant 0 : i32
    %c0_i32_0 = arith.constant 0 : i32
    %c0_i32_1 = arith.constant 0 : i32
    return %c0_i32, %c0_i32_0 : i32, i32
  }
  func.func @transform_2(%arg0: i32, %arg1: i32) -> (i32, i32) {
    %c0_i32 = arith.constant 0 : i32
    %c0_i32_0 = arith.constant 0 : i32
    %c0_i32_1 = arith.constant 0 : i32
    return %c0_i32, %c0_i32_0 : i32, i32
  }
  func.func @transform_3(%arg0: i32, %arg1: i32) -> (i32, i32) {
    %c0_i32 = arith.constant 0 : i32
    %c0_i32_0 = arith.constant 0 : i32
    %c0_i32_1 = arith.constant 0 : i32
    return %c0_i32, %c0_i32_0 : i32, i32
  }
  func.func @transform_4(%arg0: i32, %arg1: i32) -> (i32, i32) {
    %c0_i32 = arith.constant 0 : i32
    %c0_i32_0 = arith.constant 0 : i32
    %c0_i32_1 = arith.constant 0 : i32
    return %c0_i32, %c0_i32_0 : i32, i32
  }
  func.func @transform_5(%arg0: i32, %arg1: i32) -> (i32, i32) {
    %c0_i32 = arith.constant 0 : i32
    %c0_i32_0 = arith.constant 0 : i32
    return %c0_i32, %arg1 : i32, i32
  }
  func.func @transform_6(%arg0: i32, %arg1: i32) -> (i32, i32) {
    %c0_i32 = arith.constant 0 : i32
    %c0_i32_0 = arith.constant 0 : i32
    return %c0_i32, %arg1 : i32, i32
  }
  func.func @transform_7(%arg0: i32, %arg1: i32) -> (i32, i32) {
    %c0_i32 = arith.constant 0 : i32
    return %arg0, %arg1 : i32, i32
  }
}

</mosaic_0001>

<bundles_post_ra>
// kernel: tpu_custom_call.1
= control target key start
LH: loop header
LB: loop body
LE: loop exit
PB: predicated region body
PF: predicated region fallthrough
CT: control target
= control target key end

     0   :  { %12 = vsyncpa [#allocation4], 0  ;;  %s835_s0 = inlined_call_operand.hbm [shape: f32[16,32], index: 0, kind: input, shape index: {}]   ;;  %s836_s1 = inlined_call_operand.hbm [shape: f32[32,32], index: 1, kind: input, shape index: {}]   ;;  %s837_s2 = inlined_call_operand.hbm [shape: f32[1,32], index: 2, kind: input, shape index: {}]   ;;  %s838_s3 = inlined_call_operand.hbm [shape: f32[1,32], index: 3, kind: input, shape index: {}]   ;;  %s839_s4 = inlined_call_operand.hbm [shape: f32[1,32], index: 4, kind: input, shape index: {}]   ;;  %s840_s5 = inlined_call_operand.hbm [shape: f32[32,128], index: 5, kind: input, shape index: {}]   ;;  %s841_s6 = inlined_call_operand.hbm [shape: f32[1,128], index: 6, kind: input, shape index: {}]   ;;  %s842_s7 = inlined_call_operand.hbm [shape: f32[16,128], index: 7, kind: output, shape index: {}]  }
   0x1   :  { %13 = vsyncpa [#allocation7], 0 }
   0x2   :  { %14 = vsyncpa [#allocation10], 0 }
   0x3   :  { %15 = vsyncpa [#allocation13], 0 }
   0x4   :  { %16 = vsyncpa [#allocation5], 0  ;;  %s652_s24 = smov [#allocation6]   ;;  %s653_s26 = smov [#allocation9]  }
   0x5   :  { %s34_s25 = sshll.u32 %s652_s24, 4  ;;  %s57_s27 = sshll.u32 %s653_s26, 4  ;;  %s35_s25 = int_to_ptr.vmem [resolvable:$true] %s34_s25  ;;  %s702_s27 = int_to_ptr.vmem [resolvable:$true] %s57_s27 }
   0x6   :  { %s466_s30 = scalar_lea.hbm %s836_s1, 512 }
   0x7   :  { %p467_p0 = scmp.ne.s32.totalorder %s836_s1, %s466_s30  ;;  %p470_p1 = scmp.lt.u32.totalorder %s466_s30, %s836_s1 }
   0x9   :  { %p472_p2 = pnand %p470_p1, %p467_p0 }
   0xb   :  { %475 = shalt.err (!%p472_p2)
}
   0xc   :  { %s476_s12 = scalar_lea.vmem %s35_s25, 512  ;;  %p481_p4 = scmp.lt.s32.totalorder %s35_s25, %s35_s25 }
   0xd   :  { %p477_p3 = scmp.ne.s32.totalorder %s35_s25, %s476_s12  ;;  %p482_p5 = scmp.lt.s32.totalorder %s476_s12, %s476_s12 }
   0xf   :  { %p483_p6 = por %p482_p5, %p481_p4 }
  0x11   :  { %p484_p7 = pnand %p483_p6, %p477_p3 }
  0x13   :  { %487 = shalt.err (!%p484_p7)
}
  0x14   :  { %s654_s13 = smov 128   ;;  %s655_s14 = smov 8  }
  0x15   :  { %40 = dma.hbm_to_vmem [thread:$0]  %s836_s1, 512, %s35_s25, [#allocation7], %s654_s13, %s654_s13, %s655_s14  }
  0x16   :  { %s488_s19 = scalar_lea.hbm %s838_s3, 16 }
  0x17   :  { %p489_p8 = scmp.ne.s32.totalorder %s838_s3, %s488_s19  ;;  %p492_p9 = scmp.lt.u32.totalorder %s488_s19, %s838_s3 }
  0x19   :  { %p494_p10 = pnand %p492_p9, %p489_p8 }
  0x1b   :  { %497 = shalt.err (!%p494_p10)
}
  0x1c   :  { %s498_s24 = scalar_lea.vmem %s702_s27, 16  ;;  %s502_s1 = scalar_lea.vmem %s702_s27, 32 }
  0x1d   :  { %p499_p11 = scmp.ne.s32.totalorder %s702_s27, %s498_s24  ;;  %p503_p12 = scmp.lt.s32.totalorder %s702_s27, %s702_s27 }
  0x1e   :  { %p504_p13 = scmp.lt.s32.totalorder %s502_s1, %s498_s24 }
  0x20   :  { %p505_p0 = por %p504_p13, %p503_p12 }
  0x22   :  { %p506_p1 = pnand %p505_p0, %p499_p11 }
  0x24   :  { %509 = shalt.err (!%p506_p1)
}
  0x25   :  { %60 = dma.hbm_to_vmem [thread:$0]  %s838_s3, 16, %s702_s27, [#allocation10]  }
  0x26   :  { %s656_s28 = smov [#allocation12]   ;;  %s657_s30 = smov [#allocation3]  }
  0x27   :  { %s76_s29 = sshll.u32 %s656_s28, 4  ;;  %s22_s8 = sshll.u32 %s657_s30, 4  ;;  %s77_s29 = int_to_ptr.vmem [resolvable:$true] %s76_s29  ;;  %s737_s8 = int_to_ptr.vmem [resolvable:$true] %s22_s8 }
  0x28   :  { %s510_s11 = scalar_lea.hbm %s840_s5, 512 }
  0x29   :  { %p511_p2 = scmp.ne.s32.totalorder %s840_s5, %s510_s11  ;;  %p514_p3 = scmp.lt.u32.totalorder %s510_s11, %s840_s5 }
  0x2b   :  { %p516_p4 = pnand %p514_p3, %p511_p2 }
  0x2d   :  { %519 = shalt.err (!%p516_p4)
}
  0x2e   :  { %s520_s3 = scalar_lea.vmem %s77_s29, 512  ;;  %p525_p6 = scmp.lt.s32.totalorder %s77_s29, %s77_s29 }
  0x2f   :  { %p521_p5 = scmp.ne.s32.totalorder %s77_s29, %s520_s3  ;;  %p526_p7 = scmp.lt.s32.totalorder %s520_s3, %s520_s3 }
  0x31   :  { %p527_p8 = por %p526_p7, %p525_p6 }
  0x33   :  { %p528_p9 = pnand %p527_p8, %p521_p5 }
  0x35   :  { %531 = shalt.err (!%p528_p9)
}
  0x36   :  { %82 = dma.hbm_to_vmem [thread:$0]  %s840_s5, 512, %s77_s29, [#allocation13], %s654_s13, %s654_s13, %s655_s14  }
  0x37   :  { %s532_s21 = scalar_lea.hbm %s835_s0, 256 }
  0x38   :  { %p533_p10 = scmp.ne.s32.totalorder %s835_s0, %s532_s21  ;;  %p536_p11 = scmp.lt.u32.totalorder %s532_s21, %s835_s0 }
  0x3a   :  { %p538_p12 = pnand %p536_p11, %p533_p10 }
  0x3c   :  { %541 = shalt.err (!%p538_p12)
}
  0x3d   :  { %s542_s25 = scalar_lea.vmem %s737_s8, 256  ;;  %p547_p0 = scmp.lt.s32.totalorder %s737_s8, %s737_s8 }
  0x3e   :  { %p543_p13 = scmp.ne.s32.totalorder %s737_s8, %s542_s25  ;;  %p548_p1 = scmp.lt.s32.totalorder %s542_s25, %s542_s25 }
  0x40   :  { %p549_p2 = por %p548_p1, %p547_p0 }
  0x42   :  { %p550_p3 = pnand %p549_p2, %p543_p13 }
  0x44   :  { %553 = shalt.err (!%p550_p3)
}
  0x45   :  { %28 = dma.hbm_to_vmem [thread:$0]  %s835_s0, 256, %s737_s8, [#allocation4], %s654_s13, %s654_s13, %s655_s14  }
  0x46   :  { %s658_s28 = smov [#allocation8]   ;;  %s659_s30 = smov [#allocation11]  }
  0x47   :  { %s47_s29 = sshll.u32 %s658_s28, 4  ;;  %s67_s9 = sshll.u32 %s659_s30, 4  ;;  %s48_s29 = int_to_ptr.vmem [resolvable:$true] %s47_s29  ;;  %s68_s9 = int_to_ptr.vmem [resolvable:$true] %s67_s9 }
  0x48   :  { %s554_s12 = scalar_lea.hbm %s837_s2, 16 }
  0x49   :  { %p555_p4 = scmp.ne.s32.totalorder %s837_s2, %s554_s12  ;;  %p558_p5 = scmp.lt.u32.totalorder %s554_s12, %s837_s2 }
  0x4b   :  { %p560_p6 = pnand %p558_p5, %p555_p4 }
  0x4d   :  { %563 = shalt.err (!%p560_p6)
}
  0x4e   :  { %s564_s0 = scalar_lea.vmem %s48_s29, 16  ;;  %s568_s8 = scalar_lea.vmem %s48_s29, 32 }
  0x4f   :  { %p565_p7 = scmp.ne.s32.totalorder %s48_s29, %s564_s0  ;;  %p569_p8 = scmp.lt.s32.totalorder %s48_s29, %s48_s29 }
  0x50   :  { %p570_p9 = scmp.lt.s32.totalorder %s568_s8, %s564_s0 }
  0x52   :  { %p571_p10 = por %p570_p9, %p569_p8 }
  0x54   :  { %p572_p11 = pnand %p571_p10, %p565_p7 }
  0x56   :  { %575 = shalt.err (!%p572_p11)
}
  0x57   :  { %50 = dma.hbm_to_vmem [thread:$0]  %s837_s2, 16, %s48_s29, [#allocation7]  }
  0x58   :  { %s576_s21 = scalar_lea.hbm %s839_s4, 16 }
  0x59   :  { %p577_p12 = scmp.ne.s32.totalorder %s839_s4, %s576_s21  ;;  %p580_p13 = scmp.lt.u32.totalorder %s576_s21, %s839_s4 }
  0x5b   :  { %p582_p0 = pnand %p580_p13, %p577_p12 }
  0x5d   :  { %585 = shalt.err (!%p582_p0)
}
  0x5e   :  { %s586_s25 = scalar_lea.vmem %s68_s9, 16  ;;  %s590_s5 = scalar_lea.vmem %s68_s9, 32 }
  0x5f   :  { %p587_p1 = scmp.ne.s32.totalorder %s68_s9, %s586_s25  ;;  %p591_p2 = scmp.lt.s32.totalorder %s68_s9, %s68_s9 }
  0x60   :  { %p592_p3 = scmp.lt.s32.totalorder %s590_s5, %s586_s25 }
  0x62   :  { %p593_p4 = por %p592_p3, %p591_p2 }
  0x64   :  { %p594_p5 = pnand %p593_p4, %p587_p1 }
  0x66   :  { %597 = shalt.err (!%p594_p5)
}
  0x67   :  { %70 = dma.hbm_to_vmem [thread:$0]  %s839_s4, 16, %s68_s9, [#allocation10]  }
  0x68   :  { %s660_s28 = smov [#allocation14]   ;;  %s598_s11 = scalar_lea.hbm %s841_s6, 16 }
  0x69   :  { %s89_s29 = sshll.u32 %s660_s28, 4  ;;  %p599_p6 = scmp.ne.s32.totalorder %s841_s6, %s598_s11  ;;  %s90_s29 = int_to_ptr.vmem [resolvable:$true] %s89_s29 }
  0x6a   :  { %p602_p7 = scmp.lt.u32.totalorder %s598_s11, %s841_s6 }
  0x6c   :  { %p604_p8 = pnand %p602_p7, %p599_p6 }
  0x6e   :  { %607 = shalt.err (!%p604_p8)
}
  0x6f   :  { %s608_s3 = scalar_lea.vmem %s90_s29, 16  ;;  %s612_s4 = scalar_lea.vmem %s90_s29, 32 }
  0x70   :  { %p609_p9 = scmp.ne.s32.totalorder %s90_s29, %s608_s3  ;;  %p613_p10 = scmp.lt.s32.totalorder %s90_s29, %s90_s29 }
  0x71   :  { %p614_p11 = scmp.lt.s32.totalorder %s612_s4, %s608_s3 }
  0x73   :  { %p615_p12 = por %p614_p11, %p613_p10 }
  0x75   :  { %p616_p13 = pnand %p615_p12, %p609_p9 }
  0x77   :  { %619 = shalt.err (!%p616_p13)
}
  0x78   :  { %92 = dma.hbm_to_vmem [thread:$0]  %s841_s6, 16, %s90_s29, [#allocation13]  }
  0x79   :  { %642 = dma.done.wait [#allocation4], 256  }
  0x7a   :  { %643 = vsyncadd [#allocation4], 4294967040 }
  0x7b   :  { %644 = dma.done.wait [#allocation7], 528  }
  0x7c   :  { %645 = vsyncadd [#allocation7], 4294966768 }
  0x7d   :  { %646 = dma.done.wait [#allocation10], 32  }
  0x7e   :  { %647 = vsyncadd [#allocation10], 4294967264 }
  0x7f   :  { %648 = dma.done.wait [#allocation13], 528  }
  0x80   :  { %649 = vsyncadd [#allocation13], 4294966768  ;;  %vm131_vm0 = vcmask 261120   ;;  %v120_v0 = vld [vmem:[#allocation6] sm:$0xff]  ;;  %v121_v1 = vld [vmem:[#allocation6 + $0x8] sm:$0xff]  ;;  %s661_s6 = smov [#allocation15]  }
  0x81   :  { %v122_v2 = vld [vmem:[#allocation6 + $0x10] sm:$0xff]  ;;  %v432_v3 = vpack.c.bf16 %v121_v1, %v120_v0  ;;  %v123_v4 = vld [vmem:[#allocation6 + $0x18] sm:$0xff]  ;;  %v390_v8 = vld [vmem:[#allocation8] ss:$0 sm:$0xff]  ;;  %s375_s8 = sshll.u32 %s661_s6, 4  ;;  %s376_s8 = int_to_ptr.vmem [resolvable:$true] %s375_s8 }
  0x82   :  { %v118_v5 = vld [vmem:[#allocation3] sm:$0xff]  ;;  %v436_v6 = vpack.c.bf16 %v123_v4, %v122_v2  ;;  %v119_v7 = vld [vmem:[#allocation3 + $0x8] sm:$0xff]  ;;  %v275_v29 = vld [vmem:[#allocation12] sm:$0xff]  ;;  %s620_s27 = scalar_lea.vmem %s376_s8, 256  ;;  %p625_p1 = scmp.lt.s32.totalorder %s376_s8, %s376_s8 }
  0x83   :  { %418 = vmatprep.mubr.msk.f32.mxu0 %vm131_vm0, %v118_v5  ;;  %433 = vmatprep.subr.bf16.mxu0 %v432_v3  ;;  %v276_v30 = vld [vmem:[#allocation12 + $0x8] sm:$0xff]  ;;  %v277_v32 = vld [vmem:[#allocation12 + $0x10] sm:$0xff]  ;;  %v278_v33 = vld [vmem:[#allocation12 + $0x18] sm:$0xff]  ;;  %p621_p0 = scmp.ne.s32.totalorder %s376_s8, %s620_s27  ;;  %p626_p2 = scmp.lt.s32.totalorder %s620_s27, %s620_s27 }
  0x84   :  { %435 = vmatpush3.bf16.msra.mxu0 %v432_v3  ;;  %v440_v31 = vpack.c.bf16 %v276_v30, %v275_v29  ;;  %v444_v34 = vpack.c.bf16 %v278_v33, %v277_v32  ;;  %v393_v51 = vld [vmem:[#allocation9] ss:$0 sm:$0xff]  ;;  %v394_v53 = vld [vmem:[#allocation11] ss:$0 sm:$0xff]  ;;  %v395_v63 = vld [vmem:[#allocation14] ss:$0 sm:$0xff] }
  0x85   :  { %437 = vmatprep.subr.bf16.mxu0 %v436_v6  ;;  %p627_p3 = por %p626_p2, %p625_p1 }
  0x86   :  { %441 = vmatprep.subr.bf16.mxu1 %v440_v31 }
  0x87   :  { %443 = vmatpush3.bf16.msra.mxu1 %v440_v31  ;;  %p628_p4 = pnand %p627_p3, %p621_p0 }
  0x88   :  { %439 = vmatpush3.bf16.msra.mxu0 %v436_v6  ;;  %445 = vmatprep.subr.bf16.mxu1 %v444_v34 }
  0x8b   :  { %419 = vmatmul.mubr.msk.f32.vlgmr.msra.gmra.mrb[0].mxu0 %vm131_vm0, %v119_v7  ;;  %447 = vmatpush3.bf16.msra.mxu1 %v444_v34 }
 0x15e   :  { %v420_v9 = vpop.f32.mrb[0].mxu0 }
 0x15f   :  { %v210_v10 = vadd.f32 %v420_v9, %v390_v8  ;;  %v204_v11 = vpop.f32.mrb[1].mxu0 }
 0x160   :  { %v205_v12 = vadd.f32 %v390_v8, %v204_v11 }
 0x161   :  { %v216_v13 = vmul.f32 0.70710677, %v210_v10  ;;  %v214_v18 = vmul.f32 0.5, %v210_v10 }
 0x162   :  { %v215_v14 = vmul.f32 0.70710677, %v205_v12  ;;  %v213_v19 = vmul.f32 0.5, %v205_v12 }
 0x163   :  { %458 = verf.f32 %v216_v13 }
 0x164   :  { %460 = verf.f32 %v215_v14 }
 0x16d   :  { %v459_v15 = vpop.eup %458 }
 0x16e   :  { %v461_v16 = vpop.eup %460  ;;  %v220_v17 = vadd.f32 1.0, %v459_v15 }
 0x16f   :  { %v219_v20 = vadd.f32 1.0, %v461_v16 }
 0x170   :  { %v222_v21 = vmul.f32 %v220_v17, %v214_v18 }
 0x171   :  { %v221_v22 = vmul.f32 %v219_v20, %v213_v19 }
 0x172   :  { %v230_v26 = vmul.f32 %v222_v21, %v222_v21  ;;  %v226_v27 = vsel %vm131_vm0, %v222_v21, 0.0 }
 0x173   :  { %v223_v23 = vsel %vm131_vm0, %v221_v22, 0.0  ;;  %v229_v24 = vmul.f32 %v221_v22, %v221_v22 }
 0x174   :  { %224 = vadd.xlane.f32.xlu0 %v223_v23  ;;  %v234_v28 = vsel %vm131_vm0, %v230_v26, 0.0 }
 0x175   :  { %v231_v25 = vsel %vm131_vm0, %v229_v24, 0.0 }
 0x176   :  { %232 = vadd.xlane.f32.xlu1 %v231_v25 }
 0x178   :  { %227 = vadd.xlane.f32.xlu0 %v226_v27 }
 0x17a   :  { %235 = vadd.xlane.f32.xlu1 %v234_v28 }
 0x201   :  { %v225_v35 = vpop.xlane.xlu0 %224 }
 0x202   :  { %v237_v36 = vmul.f32 0.03125, %v225_v35 }
 0x203   :  { %v233_v37 = vpop.xlane.xlu1 %232 }
 0x204   :  { %v241_v38 = vmul.f32 %v237_v36, %v237_v36  ;;  %v239_v39 = vmul.f32 0.03125, %v233_v37  ;;  %v245_v49 = vsub.f32 %v221_v22, %v237_v36 }
 0x205   :  { %v228_v40 = vpop.xlane.xlu0 %227 }
 0x206   :  { %v243_v41 = vsub.f32 %v239_v39, %v241_v38  ;;  %v238_v42 = vmul.f32 0.03125, %v228_v40 }
 0x207   :  { %v236_v43 = vpop.xlane.xlu1 %235 }
 0x208   :  { %v247_v44 = vadd.f32 1e-12, %v243_v41  ;;  %v242_v45 = vmul.f32 %v238_v42, %v238_v42  ;;  %v240_v46 = vmul.f32 0.03125, %v236_v43  ;;  %v246_v55 = vsub.f32 %v222_v21, %v238_v42 }
 0x20a   :  { %462 = vrsqrt.f32 %v247_v44  ;;  %v244_v47 = vsub.f32 %v240_v46, %v242_v45 }
 0x20c   :  { %v248_v48 = vadd.f32 1e-12, %v244_v47 }
 0x20e   :  { %464 = vrsqrt.f32 %v248_v48 }
 0x214   :  { %v463_v50 = vpop.eup %462 }
 0x215   :  { %v251_v52 = vmul.f32 %v463_v50, %v245_v49 }
 0x217   :  { %v260_v54 = vmul.f32 %v393_v51, %v251_v52 }
 0x218   :  { %v465_v56 = vpop.eup %464 }
 0x219   :  { %v269_v57 = vadd.f32 %v394_v53, %v260_v54  ;;  %v252_v58 = vmul.f32 %v465_v56, %v246_v55 }
 0x21b   :  { %271 = vst.msk [vmem:[#allocation2] sm:$0xff] %vm131_vm0, %v269_v57  ;;  %v261_v59 = vmul.f32 %v393_v51, %v252_v58 }
 0x21d   :  { %v270_v60 = vadd.f32 %v394_v53, %v261_v59 }
 0x21f   :  { %272 = vst.msk [vmem:[#allocation2 + $0x8] sm:$0xff] %vm131_vm0, %v270_v60 }
 0x222   :  { %v273_v61 = vld [vmem:[#allocation2] sm:$0xff] }
 0x223   :  { %429 = vmatprep.mubr.msk.f32.mxu1 %vm131_vm0, %v273_v61 }
 0x226   :  { %v274_v62 = vld [vmem:[#allocation2 + $0x8] sm:$0xff] }
 0x227   :  { %430 = vmatmul.mubr.msk.f32.vlgmr.msra.gmra.mrb[0].mxu1 %vm131_vm0, %v274_v62 }
 0x2fa   :  { %v431_v0 = vpop.f32.mrb[0].mxu1 }
 0x2fb   :  { %v365_v1 = vadd.f32 %v431_v0, %v395_v63  ;;  %v359_v2 = vpop.f32.mrb[1].mxu1 }
 0x2fc   :  { %v360_v3 = vadd.f32 %v395_v63, %v359_v2 }
 0x2fd   :  { %369 = vst [vmem:[#allocation15 + $0x8] sm:$0xff] %v365_v1 }
 0x2fe   :  { %368 = vst [vmem:[#allocation15] sm:$0xff] %v360_v3 }
 0x2ff   :  { %631 = shalt.err (!%p628_p4)
}
 0x300   :  { %s632_s20 = scalar_lea.hbm %s842_s7, 256 }
 0x301   :  { %p633_p5 = scmp.ne.s32.totalorder %s842_s7, %s632_s20  ;;  %p636_p6 = scmp.lt.u32.totalorder %s632_s20, %s842_s7 }
 0x303   :  { %p638_p7 = pnand %p636_p6, %p633_p5 }
 0x305   :  { %641 = shalt.err (!%p638_p7)
}
 0x306   :  { %381 = dma.vmem_to_hbm [thread:$0]  %s376_s8, 256, %s842_s7, [#allocation5], %s654_s13, %s654_s13, %s655_s14  }
 0x307   :  { %650 = dma.done.wait [#allocation5], 256  }
 0x308   :  { %651 = vsyncadd [#allocation5], 4294967040 }
 0x309   :  { %385 = vsyncpa [#allocation4], 1 }
 0x30a   :  { %386 = vsyncpa [#allocation7], 1 }
 0x30b   :  { %387 = vsyncpa [#allocation10], 1 }
 0x30c   :  { %388 = vsyncpa [#allocation13], 1 }
 0x30d   :  { %389 = vsyncpa [#allocation5], 1 }

</bundles_post_ra>
